<compile_context>
chip_gen: v7x
topology: tpu7x:2x2x1
jax: 0.10.0
libtpu: 0.0.40
codegen_flags: <defaults>
</compile_context>

<pallas_src>
import jax
import jax.numpy as jnp
from jax.experimental import pallas as pl
from jax.experimental.pallas import tpu as pltpu


def _sce_kernel(logits_ref, targets_ref, qm1_ref, out_ref):
    # Upcast to f32 in-register (v5e VPU has no bf16 math; bandwidth win still applies).
    x = logits_ref[...].astype(jnp.float32)        # (tb, tn)
    z = targets_ref[...].astype(jnp.float32)       # (tb, tn)
    qm1 = qm1_ref[...].astype(jnp.float32)         # (1, tn) -> broadcast over batch
    w = 1.0 + qm1 * z
    softplus_neg_abs = jnp.log1p(jnp.exp(-jnp.abs(x)))   # exp/log on EUP
    relu_neg = jnp.maximum(-x, 0.0)                      # torch.clamp(-logits, 0)
    loss = (1.0 - z) * x + w * (softplus_neg_abs + relu_neg)
    out_ref[...] = loss.astype(out_ref.dtype)


def _pick_tiles(B, N, in_itemsize):
    """Pick (tile_b, tile_n): ~2 MiB per input block, lane-dense last dim."""
    TARGET_BYTES = 2 << 20
    # Tile N only when it is large; otherwise use the full (lane-dense) last dim.
    tile_n = N if N <= 2048 else 2048            # 2048 is a multiple of 128
    rows = TARGET_BYTES // (max(in_itemsize, 2) * tile_n)
    rows = max(8, (rows // 8) * 8)               # multiple of 8 (sublane)
    b_cap = ((B + 7) // 8) * 8                   # don't exceed (rounded-up) batch
    tile_b = max(8, min(rows, b_cap))
    return tile_b, tile_n


def sigmoid_cross_entropy_loss(logits, targets, pos_weights=None, *, out_dtype=None):
    """logits, targets: (B, N) float32/bf16.  pos_weights: (N,) or None.

    Returns elementwise losses of shape (B, N), matching the PyTorch module.
    """
    B, N = logits.shape
    if out_dtype is None:
        out_dtype = logits.dtype

    # Precompute (pos_weights - 1) once; kernel computes w = 1 + qm1 * z.
    if pos_weights is None:
        qm1 = jnp.zeros((1, N), dtype=jnp.float32)
    else:
        pos_weights = jnp.asarray(pos_weights, dtype=jnp.float32)
        qm1 = (pos_weights - 1.0).reshape(1, N)

    in_itemsize = max(jnp.dtype(logits.dtype).itemsize,
                      jnp.dtype(targets.dtype).itemsize)
    tile_b, tile_n = _pick_tiles(B, N, in_itemsize)
    grid = (pl.cdiv(B, tile_b), pl.cdiv(N, tile_n))

    # Double-buffered VMEM footprint: (logits + targets + out) tiles x 2 buffers + qm1.
    per_step = tile_b * tile_n * (jnp.dtype(logits.dtype).itemsize
                                  + jnp.dtype(targets.dtype).itemsize
                                  + jnp.dtype(out_dtype).itemsize) + tile_n * 4
    vmem_limit_bytes = int(min(max(2 * per_step + (2 << 20), 16 << 20), 32 << 20))

    bytes_accessed = (B * N * (jnp.dtype(logits.dtype).itemsize
                               + jnp.dtype(targets.dtype).itemsize
                               + jnp.dtype(out_dtype).itemsize)
                      + N * 4)
    cost = pl.CostEstimate(flops=6 * B * N,
                           transcendentals=2 * B * N,
                           bytes_accessed=bytes_accessed)

    return pl.pallas_call(
        _sce_kernel,
        out_shape=jax.ShapeDtypeStruct((B, N), out_dtype),
        grid_spec=pltpu.PrefetchScalarGridSpec(
            num_scalar_prefetch=0,
            grid=grid,
            in_specs=[
                pl.BlockSpec((tile_b, tile_n), lambda i, j: (i, j)),  # logits tile
                pl.BlockSpec((tile_b, tile_n), lambda i, j: (i, j)),  # targets tile
                pl.BlockSpec((1, tile_n), lambda i, j: (0, j)),       # (pos_weights - 1)
            ],
            out_specs=pl.BlockSpec((tile_b, tile_n), lambda i, j: (i, j)),
        ),
        compiler_params=pltpu.CompilerParams(
            dimension_semantics=("parallel", "parallel"),
            vmem_limit_bytes=vmem_limit_bytes,
        ),
        cost_estimate=cost,
    )(logits, targets, qm1)


def _reference(logits, targets, pos_weights):
    x = logits.astype(jnp.float32)
    z = targets.astype(jnp.float32)
    if pos_weights is None:
        w = 1.0
    else:
        w = 1.0 + (jnp.asarray(pos_weights, jnp.float32)[None, :] - 1.0) * z
    return (1.0 - z) * x + w * (jnp.log1p(jnp.exp(-jnp.abs(x))) + jnp.maximum(-x, 0.0))


if __name__ == "__main__":
    key = jax.random.PRNGKey(0)
    k1, k2, k3 = jax.random.split(key, 3)

    B, N = 8, 128  # (batch, num_labels)
    logits = jax.random.normal(k1, (B, N), dtype=jnp.float32) * 3.0
    targets = (jax.random.uniform(k2, (B, N)) > 0.5).astype(jnp.float32)
    pos_weights = 0.5 + jax.random.uniform(k3, (N,), dtype=jnp.float32) * 2.0

    # f32 path with pos_weights
    out = jax.block_until_ready(sigmoid_cross_entropy_loss(logits, targets, pos_weights))
    ref = _reference(logits, targets, pos_weights)
    assert out.shape == (B, N)
    assert jnp.allclose(out, ref, atol=1e-5, rtol=1e-5), "mismatch vs reference"

    # pos_weights=None path (weights == 1)
    out_nw = jax.block_until_ready(sigmoid_cross_entropy_loss(logits, targets, None))
    ref_nw = _reference(logits, targets, None)
    assert jnp.allclose(out_nw, ref_nw, atol=1e-5, rtol=1e-5), "mismatch (no weights)"

    # bf16 inputs (halved HBM read traffic), f32 output; kernel upcasts internally
    l_bf = logits.astype(jnp.bfloat16)
    t_bf = targets.astype(jnp.bfloat16)
    out_bf = jax.block_until_ready(
        sigmoid_cross_entropy_loss(l_bf, t_bf, pos_weights, out_dtype=jnp.float32))
    ref_bf = _reference(l_bf.astype(jnp.float32), t_bf.astype(jnp.float32), pos_weights)
    assert jnp.allclose(out_bf, ref_bf, atol=1e-5, rtol=1e-5), "mismatch (bf16 inputs)"

    # partial tiles: B not a multiple of 8, N not a multiple of 128
    B2, N2 = 20, 200
    l2 = jax.random.normal(k1, (B2, N2), dtype=jnp.float32)
    t2 = (jax.random.uniform(k2, (B2, N2)) > 0.5).astype(jnp.float32)
    out2 = jax.block_until_ready(sigmoid_cross_entropy_loss(l2, t2, None))
    assert jnp.allclose(out2, _reference(l2, t2, None), atol=1e-5, rtol=1e-5), \
        "mismatch (partial tiles)"

    print("KERNEL_OK")
</pallas_src>

<mosaic_0001>
module attributes {stable_mosaic.version = 11 : i64} {
  func.func @_sce_kernel(%arg0: i32, %arg1: i32, %arg2: memref<8x128xf32, #tpu.memory_space<vmem>>, %arg3: memref<8x128xf32, #tpu.memory_space<vmem>>, %arg4: memref<1x128xf32, #tpu.memory_space<vmem>>, %arg5: memref<8x128xf32, #tpu.memory_space<vmem>>) attributes {dimension_semantics = [#tpu.dimension_semantics<parallel>, #tpu.dimension_semantics<parallel>], iteration_bounds = array<i64: 1, 1>, scalar_prefetch = 0 : i64, scratch_operands = 0 : i64, tpu.core_type = #tpu.core_type<tc>, window_params = [{transform_indices = @transform_0, window_bounds = array<i64: 8, 128>}, {transform_indices = @transform_1, window_bounds = array<i64: 8, 128>}, {transform_indices = @transform_2, window_bounds = array<i64: 1, 128>}, {transform_indices = @transform_3, window_bounds = array<i64: 8, 128>}]} {
    %c0 = arith.constant 0 : index
    %c0_0 = arith.constant 0 : index
    %0 = vector.load %arg2[%c0, %c0_0] : memref<8x128xf32, #tpu.memory_space<vmem>>, vector<8x128xf32>
    %c0_1 = arith.constant 0 : index
    %c0_2 = arith.constant 0 : index
    %1 = vector.load %arg3[%c0_1, %c0_2] : memref<8x128xf32, #tpu.memory_space<vmem>>, vector<8x128xf32>
    %c0_3 = arith.constant 0 : index
    %c0_4 = arith.constant 0 : index
    %2 = vector.load %arg4[%c0_3, %c0_4] : memref<1x128xf32, #tpu.memory_space<vmem>>, vector<1x128xf32>
    %3 = vector.broadcast %2 : vector<1x128xf32> to vector<8x128xf32>
    %4 = arith.mulf %3, %1 : vector<8x128xf32>
    %cst = arith.constant 1.000000e+00 : f32
    %5 = vector.broadcast %cst : f32 to vector<8x128xf32>
    %6 = arith.addf %5, %4 : vector<8x128xf32>
    %7 = math.absf %0 : vector<8x128xf32>
    %cst_5 = arith.constant 0.000000e+00 : f32
    %8 = vector.broadcast %cst_5 : f32 to vector<8x128xf32>
    %9 = arith.subf %8, %7 : vector<8x128xf32>
    %10 = math.exp %9 : vector<8x128xf32>
    %11 = math.log1p %10 : vector<8x128xf32>
    %cst_6 = arith.constant 0.000000e+00 : f32
    %12 = vector.broadcast %cst_6 : f32 to vector<8x128xf32>
    %13 = arith.subf %12, %0 : vector<8x128xf32>
    %cst_7 = arith.constant 0.000000e+00 : f32
    %14 = vector.broadcast %cst_7 : f32 to vector<8x128xf32>
    %15 = arith.maximumf %13, %14 : vector<8x128xf32>
    %cst_8 = arith.constant 1.000000e+00 : f32
    %16 = vector.broadcast %cst_8 : f32 to vector<8x128xf32>
    %17 = arith.subf %16, %1 : vector<8x128xf32>
    %18 = arith.mulf %17, %0 : vector<8x128xf32>
    %19 = arith.addf %11, %15 : vector<8x128xf32>
    %20 = arith.mulf %6, %19 : vector<8x128xf32>
    %21 = arith.addf %18, %20 : vector<8x128xf32>
    %c0_9 = arith.constant 0 : index
    %c0_10 = arith.constant 0 : index
    %22 = vector.load %arg5[%c0_9, %c0_10] : memref<8x128xf32, #tpu.memory_space<vmem>>, vector<8x128xf32>
    tpu.vector_store %arg5[%c0_9, %c0_10], %21 {strides = array<i32>} : memref<8x128xf32, #tpu.memory_space<vmem>>, vector<8x128xf32>,
    return
  }
  func.func @transform_0(%arg0: i32, %arg1: i32) -> (i32, i32) {
    %c0_i32 = arith.constant 0 : i32
    return %arg0, %arg1 : i32, i32
  }
  func.func @transform_1(%arg0: i32, %arg1: i32) -> (i32, i32) {
    %c0_i32 = arith.constant 0 : i32
    return %arg0, %arg1 : i32, i32
  }
  func.func @transform_2(%arg0: i32, %arg1: i32) -> (i32, i32) {
    %c0_i32 = arith.constant 0 : i32
    %c0_i32_0 = arith.constant 0 : i32
    return %c0_i32, %arg1 : i32, i32
  }
  func.func @transform_3(%arg0: i32, %arg1: i32) -> (i32, i32) {
    %c0_i32 = arith.constant 0 : i32
    return %arg0, %arg1 : i32, i32
  }
}

</mosaic_0001>

<bundles_post_ra>
// kernel: tpu_custom_call.1
= control target key start
LH: loop header
LB: loop body
LE: loop exit
PB: predicated region body
PF: predicated region fallthrough
CT: control target
= control target key end

     0   :  { %8 = vsyncpa [#allocation3], 0  ;;  %s229_s0 = inlined_call_operand.hbm [shape: f32[8,128], index: 0, kind: input, shape index: {}]   ;;  %s230_s1 = inlined_call_operand.hbm [shape: f32[8,128], index: 1, kind: input, shape index: {}]   ;;  %s231_s2 = inlined_call_operand.vmem [shape: f32[1,128], index: 2, kind: input, shape index: {}]   ;;  %s232_s3 = inlined_call_operand.hbm [shape: f32[8,128], index: 3, kind: output, shape index: {}]  }
   0x1   :  { %9 = vsyncpa [#allocation6], 0 }
   0x2   :  { %10 = vsyncpa [#allocation4], 0  ;;  %s167_s12 = smov [#allocation2]   ;;  %s168_s14 = smov [#allocation5]  }
   0x3   :  { %s17_s13 = sshll.u32 %s167_s12, 4  ;;  %s27_s15 = sshll.u32 %s168_s14, 4  ;;  %s18_s13 = int_to_ptr.vmem [resolvable:$true] %s17_s13  ;;  %s28_s15 = int_to_ptr.vmem [resolvable:$true] %s27_s15 }
   0x4   :  { %s95_s18 = scalar_lea.hbm %s229_s0, 128 }
   0x5   :  { %p96_p0 = scmp.ne.s32.totalorder %s229_s0, %s95_s18  ;;  %p99_p1 = scmp.lt.u32.totalorder %s95_s18, %s229_s0 }
   0x7   :  { %p101_p2 = pnand %p99_p1, %p96_p0 }
   0x9   :  { %104 = shalt.err (!%p101_p2)
}
   0xa   :  { %s105_s23 = scalar_lea.vmem %s18_s13, 128  ;;  %p110_p4 = scmp.lt.s32.totalorder %s18_s13, %s18_s13 }
   0xb   :  { %p106_p3 = scmp.ne.s32.totalorder %s18_s13, %s105_s23  ;;  %p111_p5 = scmp.lt.s32.totalorder %s105_s23, %s105_s23 }
   0xd   :  { %p112_p6 = por %p111_p5, %p110_p4 }
   0xf   :  { %p113_p7 = pnand %p112_p6, %p106_p3 }
  0x11   :  { %116 = shalt.err (!%p113_p7)
}
  0x12   :  { %20 = dma.hbm_to_vmem [thread:$0]  %s229_s0, 128, %s18_s13, [#allocation3]  }
  0x13   :  { %s117_s28 = scalar_lea.hbm %s230_s1, 128 }
  0x14   :  { %p118_p8 = scmp.ne.s32.totalorder %s230_s1, %s117_s28  ;;  %p121_p9 = scmp.lt.u32.totalorder %s117_s28, %s230_s1 }
  0x16   :  { %p123_p10 = pnand %p121_p9, %p118_p8 }
  0x18   :  { %126 = shalt.err (!%p123_p10)
}
  0x19   :  { %s127_s6 = scalar_lea.vmem %s28_s15, 128  ;;  %p132_p12 = scmp.lt.s32.totalorder %s28_s15, %s28_s15 }
  0x1a   :  { %p128_p11 = scmp.ne.s32.totalorder %s28_s15, %s127_s6  ;;  %p133_p13 = scmp.lt.s32.totalorder %s127_s6, %s127_s6 }
  0x1c   :  { %p134_p0 = por %p133_p13, %p132_p12 }
  0x1e   :  { %p135_p1 = pnand %p134_p0, %p128_p11 }
  0x20   :  { %138 = shalt.err (!%p135_p1)
}
  0x21   :  { %30 = dma.hbm_to_vmem [thread:$0]  %s230_s1, 128, %s28_s15, [#allocation6]  }
  0x22   :  { %161 = dma.done.wait [#allocation3], 128  }
  0x23   :  { %162 = vsyncadd [#allocation3], 4294967168 }
  0x24   :  { %163 = dma.done.wait [#allocation6], 128  }
  0x25   :  { %164 = vsyncadd [#allocation6], 4294967168  ;;  %v39_v0 = vld [vmem:[#allocation2] sm:$0xff]  ;;  %v40_v7 = vld [vmem:[#allocation5] sm:$0xff]  ;;  %s169_s1 = smov [#allocation7]  }
  0x26   :  { %v50_v1 = vand.u32 2147483647, %v39_v0  ;;  %v87_v8 = vld [vmem:[%s231_s2] ss:$0 sm:$0xff]  ;;  %v63_v11 = vsub.f32 0.0, %v39_v0  ;;  %v65_v16 = vsub.f32 1.0, %v40_v7 }
  0x27   :  { %v48_v12 = vmul.f32 %v87_v8, %v40_v7  ;;  %s77_s10 = sshll.u32 %s169_s1, 4  ;;  %s78_s10 = int_to_ptr.vmem [resolvable:$true] %s77_s10 }
  0x28   :  { %v51_v2 = vsub.f32 0.0, %v50_v1  ;;  %v64_v15 = vmax.f32 %v63_v11, 0.0  ;;  %v66_v20 = vmul.f32 %v65_v16, %v39_v0  ;;  %s139_s2 = scalar_lea.vmem %s78_s10, 128  ;;  %p144_p3 = scmp.lt.s32.totalorder %s78_s10, %s78_s10 }
  0x29   :  { %v49_v18 = vadd.f32 1.0, %v48_v12  ;;  %p140_p2 = scmp.ne.s32.totalorder %s78_s10, %s139_s2  ;;  %p145_p4 = scmp.lt.s32.totalorder %s139_s2, %s139_s2 }
  0x2a   :  { %v52_v3 = vmul.f32 1.442695, %v51_v2 }
  0x2b   :  { %p146_p5 = por %p145_p4, %p144_p3 }
  0x2c   :  { %91 = vpow2.f32 %v52_v3 }
  0x2d   :  { %p147_p6 = pnand %p146_p5, %p140_p2 }
  0x36   :  { %v92_v4 = vpop.eup %91 }
  0x37   :  { %v54_v5 = vadd.f32 1.0, %v92_v4  ;;  %v57_v6 = vmul.f32 -0.5, %v92_v4  ;;  %v60_v10 = vand.u32 2147483647, %v92_v4 }
  0x39   :  { %93 = vlog2.f32 %v54_v5  ;;  %v58_v9 = vadd.f32 1.0, %v57_v6  ;;  %vm61_vm0 = vcmp.lt.f32.partialorder %v60_v10, 0.0004427343 }
  0x3b   :  { %v59_v13 = vmul.f32 %v92_v4, %v58_v9 }
  0x43   :  { %v94_v14 = vpop.eup %93 }
  0x44   :  { %v56_v17 = vmul.f32 0.6931472, %v94_v14 }
  0x46   :  { %v62_v19 = vsel %vm61_vm0, %v59_v13, %v56_v17 }
  0x47   :  { %v67_v21 = vadd.f32 %v64_v15, %v62_v19 }
  0x49   :  { %v68_v22 = vmul.f32 %v67_v21, %v49_v18 }
  0x4b   :  { %v69_v23 = vadd.f32 %v68_v22, %v66_v20 }
  0x4d   :  { %70 = vst [vmem:[#allocation7] sm:$0xff] %v69_v23 }
  0x4e   :  { %150 = shalt.err (!%p147_p6)
}
  0x4f   :  { %s151_s13 = scalar_lea.hbm %s232_s3, 128 }
  0x50   :  { %p152_p7 = scmp.ne.s32.totalorder %s232_s3, %s151_s13  ;;  %p155_p8 = scmp.lt.u32.totalorder %s151_s13, %s232_s3 }
  0x52   :  { %p157_p9 = pnand %p155_p8, %p152_p7 }
  0x54   :  { %160 = shalt.err (!%p157_p9)
}
  0x55   :  { %80 = dma.vmem_to_hbm [thread:$0]  %s78_s10, 128, %s232_s3, [#allocation4]  }
  0x56   :  { %165 = dma.done.wait [#allocation4], 128  }
  0x57   :  { %166 = vsyncadd [#allocation4], 4294967168 }
  0x58   :  { %84 = vsyncpa [#allocation3], 1 }
  0x59   :  { %85 = vsyncpa [#allocation6], 1 }
  0x5a   :  { %86 = vsyncpa [#allocation4], 1 }

</bundles_post_ra>
